<compile_context>
chip_gen: v7x
topology: tpu7x:2x2x1
jax: 0.10.0
libtpu: 0.0.40
codegen_flags: <defaults>
</compile_context>

<pallas_src>
import functools

import jax
import jax.numpy as jnp
from jax.experimental import pallas as pl
from jax.experimental.pallas import tpu as pltpu


# ----------------------------------------------------------------------------
# Planning helpers
# ----------------------------------------------------------------------------
def _round_up(x, m):
    return ((x + m - 1) // m) * m


def _cdiv(a, b):
    return (a + b - 1) // b


def _vmem_budget():
    """Physical VMEM with >=25% headroom; conservative fallback if unknown."""
    try:
        cap = int(pltpu.get_tpu_info().vmem_capacity_bytes)
    except Exception:
        cap = 64 << 20  # v7x per-TC size: a safe lower bound for all gens
    return max(int(cap * 0.75), 24 << 20)


def _plan(m0, k0, dbytes, budget):
    """Pick padded sizes, tile sizes and a VMEM limit for (m0, k0) features."""
    m0 = max(m0, 1)
    k0 = max(k0, 1)
    mp = _round_up(m0, 8)                 # sublane multiple only (usually == m0)

    # --- K tiling: whole K if the (mp, K) panel is small, else ~4 MiB tiles.
    panel_budget = 4 << 20
    kp_full = _round_up(k0, 128)
    if mp * kp_full * dbytes <= panel_budget:
        tk = kp = kp_full
    else:
        tk_cap = max(128, (panel_budget // (mp * dbytes)) // 128 * 128)
        n_k = _cdiv(k0, tk_cap)
        tk = _round_up(_cdiv(k0, n_k), 128)
        kp = n_k * tk

    # --- Row block: keep the whole (mp, mp) gram panel resident when it fits.
    acc_budget = 8 << 20
    if mp * mp * 4 <= acc_budget:
        tm = mp
    else:
        tm = 8
        for cand in range(mp - 8, 0, -8):
            if mp % cand == 0 and cand * mp * 4 <= acc_budget:
                tm = cand
                break

    def need(tk_, tm_):
        return (2 * mp * tk_ * dbytes     # K panel of F, double-buffered
                + 4 * tm_ * mp * 4        # gram-out / target row panels (x2 buf)
                + tm_ * mp * 4            # f32 accumulator scratch
                + (1 << 20))              # partial outputs + compiler slack

    while need(tk, tm) > budget and tk > 128:
        tk = max(128, (tk // 2) // 128 * 128)
        kp = _round_up(k0, tk)

    vmem_limit = int(max(32 << 20, min(need(tk, tm) + (8 << 20), budget)))
    return mp, kp, tm, tk, vmem_limit


def _prep_features(x, mp, kp, compute_dtype):
    """(a,b,c,d) -> (mp, kp) feature matrix; pads only when actually needed."""
    a, b, c, d = x.shape
    f = x.reshape(a * b, c * d)
    if compute_dtype is not None and f.dtype != compute_dtype:
        f = f.astype(compute_dtype)
    pad_m, pad_k = mp - f.shape[0], kp - f.shape[1]
    if pad_m or pad_k:
        f = jnp.pad(f, ((0, pad_m), (0, pad_k)))
    return f


# ----------------------------------------------------------------------------
# Kernels
# ----------------------------------------------------------------------------
def _gram_kernel(f_ref, g_ref, *, tm, scale):
    """G[i-block, :] = scale * F[i-block] @ F.T, accumulated over K tiles.

    The row block is sliced out of the resident full-row K panel (no second
    DMA stream for the same array).
    """
    i = pl.program_id(0)
    k = pl.program_id(1)

    @pl.when(k == 0)
    def _init():
        g_ref[...] = jnp.zeros_like(g_ref)

    align = tm & -tm                               # largest pow2 divisor of tm
    row = pl.multiple_of(i * tm, align)
    frow = f_ref[pl.ds(row, tm), :]                # VMEM slice, tile-aligned
    g_ref[...] += jax.lax.dot_general(
        frow, f_ref[...],
        dimension_numbers=(((1,), (1,)), ((), ())),
        preferred_element_type=jnp.float32,
    )

    @pl.when(k == pl.num_programs(1) - 1)
    def _finalize():
        g_ref[...] = g_ref[...] * scale


def _style_loss_kernel(f_ref, t_ref, part_ref, acc_ref, *, tm, scale):
    """Per row block: accumulate gram over K tiles, then emit sum((G-T)^2)."""
    i = pl.program_id(0)
    k = pl.program_id(1)

    @pl.when(k == 0)
    def _init():
        acc_ref[...] = jnp.zeros_like(acc_ref)

    align = tm & -tm
    row = pl.multiple_of(i * tm, align)
    frow = f_ref[pl.ds(row, tm), :]
    acc_ref[...] += jax.lax.dot_general(
        frow, f_ref[...],
        dimension_numbers=(((1,), (1,)), ((), ())),
        preferred_element_type=jnp.float32,
    )

    @pl.when(k == pl.num_programs(1) - 1)
    def _finalize():
        diff = acc_ref[...] * scale - t_ref[...]
        ssq = jnp.sum(diff * diff)
        part_ref[...] = jnp.full(part_ref.shape, ssq, dtype=jnp.float32)


# ----------------------------------------------------------------------------
# Wrappers
# ----------------------------------------------------------------------------
def _gram_padded(x, compute_dtype=None):
    """Padded (mp, mp) f32 gram matrix of an NCHW tensor via Pallas."""
    a, b, c, d = x.shape
    m0, k0 = a * b, c * d
    dbytes = jnp.dtype(compute_dtype if compute_dtype is not None
                       else x.dtype).itemsize
    mp, kp, tm, tk, vmem_limit = _plan(m0, k0, dbytes, _vmem_budget())
    fp = _prep_features(x, mp, kp, compute_dtype)
    scale = 1.0 / float(a * b * c * d)
    n_i, n_k = mp // tm, kp // tk

    g_pad = pl.pallas_call(
        functools.partial(_gram_kernel, tm=tm, scale=scale),
        out_shape=jax.ShapeDtypeStruct((mp, mp), jnp.float32),
        grid_spec=pltpu.PrefetchScalarGridSpec(
            num_scalar_prefetch=0,
            grid=(n_i, n_k),
            in_specs=[pl.BlockSpec((mp, tk), lambda i, k: (0, k))],  # single F stream
            out_specs=pl.BlockSpec((tm, mp), lambda i, k: (i, 0)),
        ),
        compiler_params=pltpu.CompilerParams(
            dimension_semantics=("parallel", "arbitrary"),
            vmem_limit_bytes=vmem_limit,
        ),
        cost_estimate=pl.CostEstimate(
            flops=2 * mp * mp * kp,
            transcendentals=0,
            bytes_accessed=n_i * mp * kp * dbytes + mp * mp * 4,
        ),
    )(fp)
    return g_pad, m0


def gram_matrix(x, compute_dtype=None):
    """Pallas gram matrix of an NCHW tensor (matches the torch reference)."""
    g_pad, m0 = _gram_padded(x, compute_dtype)
    return g_pad if g_pad.shape[0] == m0 else g_pad[:m0, :m0]


class StyleLoss:
    """JAX/Pallas port of the torch StyleLoss module."""

    def __init__(self, target_feature, compute_dtype=None):
        self.compute_dtype = compute_dtype
        g_pad, m0 = _gram_padded(target_feature, compute_dtype)
        g_pad = jax.lax.stop_gradient(g_pad)            # "detach"
        self._m0 = m0
        self._target_padded = g_pad                     # (mp, mp) f32, cached once
        self.target = g_pad if g_pad.shape[0] == m0 else g_pad[:m0, :m0]
        self.loss = None

    def forward(self, x):
        a, b, c, d = x.shape
        m0, k0 = a * b, c * d
        assert m0 == self._m0, "batch*channels must match the target feature"
        cd_ = self.compute_dtype
        dbytes = jnp.dtype(cd_ if cd_ is not None else x.dtype).itemsize
        mp, kp, tm, tk, vmem_limit = _plan(m0, k0, dbytes, _vmem_budget())
        fp = _prep_features(x, mp, kp, cd_)
        tp = self._target_padded                        # already (mp, mp) f32
        scale = 1.0 / float(a * b * c * d)
        n_i, n_k = mp // tm, kp // tk

        partials = pl.pallas_call(
            functools.partial(_style_loss_kernel, tm=tm, scale=scale),
            out_shape=jax.ShapeDtypeStruct((n_i, 8, 128), jnp.float32),
            grid_spec=pltpu.PrefetchScalarGridSpec(
                num_scalar_prefetch=0,
                grid=(n_i, n_k),
                in_specs=[
                    pl.BlockSpec((mp, tk), lambda i, k: (0, k)),   # features K panel
                    pl.BlockSpec((tm, mp), lambda i, k: (i, 0)),   # target row panel
                ],
                out_specs=pl.BlockSpec((1, 8, 128), lambda i, k: (i, 0, 0)),
                scratch_shapes=[pltpu.VMEM((tm, mp), jnp.float32)],
            ),
            compiler_params=pltpu.CompilerParams(
                dimension_semantics=("parallel", "arbitrary"),
                vmem_limit_bytes=vmem_limit,
            ),
            cost_estimate=pl.CostEstimate(
                flops=2 * mp * mp * kp,
                transcendentals=0,
                bytes_accessed=n_i * mp * kp * dbytes + mp * mp * 4
                + n_i * 8 * 128 * 4,
            ),
        )(fp, tp)

        # Zero-padded rows/cols contribute exactly 0; keep the ORIGINAL mean
        # denominator m0*m0 from the torch reference.
        self.loss = jnp.sum(partials[:, 0, 0]) / jnp.float32(m0 * m0)
        return x  # module returns the input unchanged

    __call__ = forward


# ----------------------------------------------------------------------------
# Demo / self-test
# ----------------------------------------------------------------------------
if __name__ == "__main__":
    key = jax.random.PRNGKey(0)
    k_t, k_x = jax.random.split(key)

    # NCHW: batch=2, channels=4, spatial=16x16 -> features (8, 256)
    target_feature = jax.random.normal(k_t, (2, 4, 16, 16), dtype=jnp.float32)
    x = jax.random.normal(k_x, (2, 4, 16, 16), dtype=jnp.float32)

    module = StyleLoss(target_feature)
    out = module(x)
    jax.block_until_ready(out)
    jax.block_until_ready(module.loss)

    # plain-JAX reference
    def ref_gram(t):
        a, b, c, d = t.shape
        f = t.reshape(a * b, c * d)
        return (f @ f.T) / (a * b * c * d)

    ref_loss = jnp.mean((ref_gram(x) - ref_gram(target_feature)) ** 2)
    assert out.shape == x.shape and jnp.allclose(out, x)
    assert jnp.allclose(module.target, ref_gram(target_feature),
                        rtol=1e-4, atol=1e-6)
    assert jnp.allclose(module.loss, ref_loss, rtol=1e-4, atol=1e-6)

    print("KERNEL_OK")
</pallas_src>

<mosaic_0001>
module attributes {stable_mosaic.version = 11 : i64} {
  func.func @_gram_kernel(%arg0: i32, %arg1: i32, %arg2: memref<8x256xf32, #tpu.memory_space<vmem>>, %arg3: memref<8x8xf32, #tpu.memory_space<vmem>>) attributes {dimension_semantics = [#tpu.dimension_semantics<parallel>, #tpu.dimension_semantics<arbitrary>], iteration_bounds = array<i64: 1, 1>, scalar_prefetch = 0 : i64, scratch_operands = 0 : i64, tpu.core_type = #tpu.core_type<tc>, window_params = [{transform_indices = @transform_0, window_bounds = array<i64: 8, 256>}, {transform_indices = @transform_1, window_bounds = array<i64: 8, 8>}]} {
    %c0_i32 = arith.constant 0 : i32
    %0 = arith.cmpi eq, %arg1, %c0_i32 : i32
    %1 = arith.extui %0 : i1 to i32
    %c0_i32_0 = arith.constant 0 : i32
    %2 = arith.cmpi ne, %1, %c0_i32_0 : i32
    scf.if %2 {
      %cst_9 = arith.constant 0.000000e+00 : f32
      %15 = vector.broadcast %cst_9 : f32 to vector<8x8xf32>
      %c0_10 = arith.constant 0 : index
      %c0_11 = arith.constant 0 : index
      %16 = vector.load %arg3[%c0_10, %c0_11] : memref<8x8xf32, #tpu.memory_space<vmem>>, vector<8x8xf32>
      tpu.vector_store %arg3[%c0_10, %c0_11], %15 {strides = array<i32>} : memref<8x8xf32, #tpu.memory_space<vmem>>, vector<8x8xf32>,
    } else {
    }
    %c8_i32 = arith.constant 8 : i32
    %3 = arith.muli %arg0, %c8_i32 : i32
    %4 = tpu.assume_multiple %3, 8 : i32
    %5 = arith.index_cast %4 : i32 to index
    %c0 = arith.constant 0 : index
    %6 = vector.load %arg2[%5, %c0] : memref<8x256xf32, #tpu.memory_space<vmem>>, vector<8x256xf32>
    %c0_1 = arith.constant 0 : index
    %c0_2 = arith.constant 0 : index
    %7 = vector.load %arg3[%c0_1, %c0_2] : memref<8x8xf32, #tpu.memory_space<vmem>>, vector<8x8xf32>
    %c0_3 = arith.constant 0 : index
    %c0_4 = arith.constant 0 : index
    %8 = vector.load %arg2[%c0_3, %c0_4] : memref<8x256xf32, #tpu.memory_space<vmem>>, vector<8x256xf32>
    %cst = arith.constant dense<0.000000e+00> : vector<8x8xf32>
    %9 = tpu.matmul %6, %8, %cst {dimension_numbers = #tpu.dot_dimension_numbers<[1], [1], [0], [0], [0, 0, 1, 0], [], []>} : vector<8x256xf32>, vector<8x256xf32>, vector<8x8xf32> -> vector<8x8xf32>
    %10 = arith.addf %7, %9 : vector<8x8xf32>
    %c0_5 = arith.constant 0 : index
    %c0_6 = arith.constant 0 : index
    %11 = vector.load %arg3[%c0_5, %c0_6] : memref<8x8xf32, #tpu.memory_space<vmem>>, vector<8x8xf32>
    tpu.vector_store %arg3[%c0_5, %c0_6], %10 {strides = array<i32>} : memref<8x8xf32, #tpu.memory_space<vmem>>, vector<8x8xf32>,
    %c0_i32_7 = arith.constant 0 : i32
    %12 = arith.cmpi eq, %arg1, %c0_i32_7 : i32
    %13 = arith.extui %12 : i1 to i32
    %c0_i32_8 = arith.constant 0 : i32
    %14 = arith.cmpi ne, %13, %c0_i32_8 : i32
    scf.if %14 {
      %c0_9 = arith.constant 0 : index
      %c0_10 = arith.constant 0 : index
      %15 = vector.load %arg3[%c0_9, %c0_10] : memref<8x8xf32, #tpu.memory_space<vmem>>, vector<8x8xf32>
      %cst_11 = arith.constant 4.8828125E-4 : f32
      %16 = vector.broadcast %cst_11 : f32 to vector<8x8xf32>
      %17 = arith.mulf %15, %16 : vector<8x8xf32>
      %c0_12 = arith.constant 0 : index
      %c0_13 = arith.constant 0 : index
      %18 = vector.load %arg3[%c0_12, %c0_13] : memref<8x8xf32, #tpu.memory_space<vmem>>, vector<8x8xf32>
      tpu.vector_store %arg3[%c0_12, %c0_13], %17 {strides = array<i32>} : memref<8x8xf32, #tpu.memory_space<vmem>>, vector<8x8xf32>,
    } else {
    }
    return
  }
  func.func @transform_0(%arg0: i32, %arg1: i32) -> (i32, i32) {
    %c0_i32 = arith.constant 0 : i32
    %c0_i32_0 = arith.constant 0 : i32
    return %c0_i32, %arg1 : i32, i32
  }
  func.func @transform_1(%arg0: i32, %arg1: i32) -> (i32, i32) {
    %c0_i32 = arith.constant 0 : i32
    %c0_i32_0 = arith.constant 0 : i32
    return %arg0, %c0_i32 : i32, i32
  }
}

</mosaic_0001>

<bundles_post_ra>
// kernel: tpu_custom_call.1
= control target key start
LH: loop header
LB: loop body
LE: loop exit
PB: predicated region body
PF: predicated region fallthrough
CT: control target
= control target key end

     0   :  { %6 = vsyncpa [#allocation3], 0  ;;  %s225_s0 = inlined_call_operand.hbm [shape: f32[8,256], index: 0, kind: input, shape index: {}]   ;;  %s226_s1 = inlined_call_operand.hbm [shape: f32[8,8], index: 1, kind: output, shape index: {}]  }
   0x1   :  { %7 = vsyncpa [#allocation4], 0  ;;  %s185_s6 = smov [#allocation2]   ;;  %s137_s10 = scalar_lea.hbm %s225_s0, 256 }
   0x2   :  { %s14_s7 = sshll.u32 %s185_s6, 4  ;;  %p138_p0 = scmp.ne.s32.totalorder %s225_s0, %s137_s10  ;;  %s15_s7 = int_to_ptr.vmem [resolvable:$true] %s14_s7 }
   0x3   :  { %p141_p1 = scmp.lt.u32.totalorder %s137_s10, %s225_s0 }
   0x5   :  { %p143_p2 = pnand %p141_p1, %p138_p0 }
   0x7   :  { %146 = shalt.err (!%p143_p2)
}
   0x8   :  { %s147_s15 = scalar_lea.vmem %s15_s7, 256  ;;  %p152_p4 = scmp.lt.s32.totalorder %s15_s7, %s15_s7 }
   0x9   :  { %p148_p3 = scmp.ne.s32.totalorder %s15_s7, %s147_s15  ;;  %p153_p5 = scmp.lt.s32.totalorder %s147_s15, %s147_s15 }
   0xb   :  { %p154_p6 = por %p153_p5, %p152_p4 }
   0xd   :  { %p155_p7 = pnand %p154_p6, %p148_p3 }
   0xf   :  { %158 = shalt.err (!%p155_p7)
}
  0x10   :  { %17 = dma.hbm_to_vmem [thread:$0]  %s225_s0, 256, %s15_s7, [#allocation3]  }
  0x11   :  { %181 = dma.done.wait [#allocation3], 256  }
  0x12   :  { %182 = vsyncadd [#allocation3], 4294967040  ;;  %vm25_vm0 = vcmask 64512   ;;  %v186_v0 = vmov 0.0   ;;  %v37_v1 = vld [vmem:[#allocation2 + $0x8] sm:$0xff]  ;;  %v36_v2 = vld [vmem:[#allocation2] sm:$0xff] }
  0x13   :  { %26 = vst.msk [vmem:[#allocation5] sm:$0xff] %vm25_vm0, %v186_v0  ;;  %38 = vmatprep.subr.mxu0 %v37_v1  ;;  %102 = vmatprep.mubr.f32.mxu0 %v37_v1  ;;  %s187_s18 = smov [#allocation5]  }
  0x14   :  { %39 = vmatpush1.xpose.msra.mxu0 %v36_v2  ;;  %s123_s0 = sshll.u32 %s187_s18, 4  ;;  %s124_s0 = int_to_ptr.vmem [resolvable:$true] %s123_s0 }
  0x15   :  { %s159_s19 = scalar_lea.vmem %s124_s0, 128  ;;  %p164_p9 = scmp.lt.s32.totalorder %s124_s0, %s124_s0 }
  0x16   :  { %p160_p8 = scmp.ne.s32.totalorder %s124_s0, %s159_s19  ;;  %p165_p10 = scmp.lt.s32.totalorder %s159_s19, %s159_s19 }
  0x17   :  { %103 = vmatmul.mubr.f32.vlgmr.msra.gmra.mrb[0].mxu0 %v36_v2 }
  0x18   :  { %p166_p11 = por %p165_p10, %p164_p9 }
  0x1a   :  { %v35_v3 = vld [vmem:[#allocation5] sm:$0xff]  ;;  %p167_p12 = pnand %p166_p11, %p160_p8 }
  0xea   :  { %v104_v4 = vpop.f32.mrb[0].mxu0 }
  0xeb   :  { %v108_v5 = vadd.f32 %v104_v4, %v35_v3  ;;  %v106_v6 = vpop.f32.mrb[1].mxu0 }
  0xed   :  { %110 = vst.msk [vmem:[#allocation5] sm:$0xff] %vm25_vm0, %v108_v5 }
  0xf4   :  { %v114_v7 = vld [vmem:[#allocation5] sm:$0xff] }
  0xf5   :  { %v115_v8 = vmul.f32 0.00048828125, %v114_v7 }
  0xf7   :  { %116 = vst.msk [vmem:[#allocation5] sm:$0xff] %vm25_vm0, %v115_v8 }
  0xf8   :  { %170 = shalt.err (!%p167_p12)
}
  0xf9   :  { %s171_s22 = scalar_lea.hbm %s226_s1, 128 }
  0xfa   :  { %p172_p13 = scmp.ne.s32.totalorder %s226_s1, %s171_s22  ;;  %p175_p0 = scmp.lt.u32.totalorder %s171_s22, %s226_s1 }
  0xfc   :  { %p177_p1 = pnand %p175_p0, %p172_p13 }
  0xfe   :  { %180 = shalt.err (!%p177_p1)
}
  0xff   :  { %126 = dma.vmem_to_hbm [thread:$0]  %s124_s0, 128, %s226_s1, [#allocation4]  }
 0x100   :  { %183 = dma.done.wait [#allocation4], 128  }
 0x101   :  { %184 = vsyncadd [#allocation4], 4294967168 }
 0x102   :  { %130 = vsyncpa [#allocation3], 1 }
 0x103   :  { %131 = vsyncpa [#allocation4], 1 }

</bundles_post_ra>
